<compile_context>
chip_gen: v7x
topology: tpu7x:2x2x1
jax: 0.10.0
libtpu: 0.0.40
codegen_flags: <defaults>
</compile_context>

<pallas_src>
import math

import jax
import jax.numpy as jnp
from jax.experimental import pallas as pl
from jax.experimental.pallas import tpu as pltpu


# ----------------------------- config ---------------------------------------
class Cfg:
    dim = 3
    out_dim = 3
    hidden_size = 32
    n_blocks = 3
    const = 30.0
    use_hierarchial_consts = False


# ----------------------------- fast sine -------------------------------------
# sin(z) for |z| up to a few hundred: round-to-nearest multiple of pi,
# 2-term Cody-Waite residual, odd polynomial on [-pi/2, pi/2], parity sign.
_INV_PI = 0.3183098861837907
_PI_HI = 3.1415927410125732       # float32(pi)
_PI_LO = -8.742277657347586e-08   # pi - float32(pi)
_S3 = -1.6666667e-01
_S5 = 8.3333310e-03
_S7 = -1.9840874e-04


def _fast_sin(z):
    k = jnp.floor(z * _INV_PI + 0.5)          # nearest integer multiple of pi
    r = z - k * _PI_HI
    r = r - k * _PI_LO                        # r in ~[-pi/2, pi/2]
    r2 = r * r
    p = r + r * r2 * (_S3 + r2 * (_S5 + r2 * _S7))
    k_i = k.astype(jnp.int32)
    return jnp.where((k_i & 1) == 0, p, -p)   # sin(z) = (-1)^k * sin(r)


# ----------------------------- kernel ---------------------------------------
def make_siren_kernel(n_rest, dim):
    """n_rest = n_blocks - 1 remaining (H,H) layers; dim is static (unrolled)."""

    def kernel(x_ref, w0_ref, b0_ref, wh_ref, bh_ref, wl_ref, bl_ref, o_ref):
        xt = x_ref[...]                    # (dim, tm)  f32
        w0 = w0_ref[...]                   # (H, dim)   f32  (layer0 folded into block0)

        # Folded first block: z = W0'·x + b0' via broadcast FMAs (K=dim=3),
        # then the first sine.  Never touches the MXU or bf16.
        z = w0[:, 0:1] * xt[0:1, :]        # (H, tm)
        for d in range(1, dim):
            z = z + w0[:, d : d + 1] * xt[d : d + 1, :]
        net = _fast_sin(z + b0_ref[...])   # (H, tm) f32

        # Remaining hidden blocks: bf16 MXU matmul, f32 bias + sine.
        for i in range(n_rest):            # static unroll (small)
            zz = jnp.dot(
                wh_ref[i],                           # (H, H) bf16 (const-folded)
                net.astype(jnp.bfloat16),            # (H, tm) bf16
                preferred_element_type=jnp.float32,
            )
            net = _fast_sin(zz + bh_ref[i])          # (H, tm) f32

        # Last layer: bf16 operands, f32 accumulation, tiny (out_dim,H) dot.
        out = jnp.dot(
            wl_ref[...],                             # (out_dim, H) bf16
            net.astype(jnp.bfloat16),
            preferred_element_type=jnp.float32,
        )
        o_ref[...] = (out + bl_ref[...]).astype(o_ref.dtype)

    return kernel


def siren_forward(x, params, cfg, *, tm=8192):
    """x: (bs, npoints, dim) -> (bs, npoints, out_dim)."""
    bs, npts, dim = x.shape
    N = bs * npts

    w0, b0, wh, bh, wl, bl = params
    H = cfg.hidden_size
    out_dim = cfg.out_dim
    nb = cfg.n_blocks

    if cfg.use_hierarchial_consts:
        consts = [cfg.const * (i + 1) for i in range(nb + 1)]
    else:
        consts = [cfg.const] * nb

    # ---- fold sine constants into hidden weights/biases (f32), transpose ----
    scale = jnp.asarray(consts[:nb], jnp.float32).reshape(nb, 1, 1)
    wht_f32 = jnp.transpose(wh, (0, 2, 1)) * scale            # (nb, H, H)
    bht_f32 = jnp.transpose(bh, (0, 2, 1)) * scale            # (nb, H, 1)
    w0t = jnp.transpose(w0)                                   # (H, dim)
    b0t = jnp.transpose(b0)                                   # (H, 1)

    # ---- fold layer 0 into hidden block 0 (exact, f32, done once) ----------
    w0p = wht_f32[0] @ w0t                                    # (H, dim)
    b0p = wht_f32[0] @ b0t + bht_f32[0]                       # (H, 1)

    n_rest = nb - 1
    if n_rest > 0:
        wh_rest = wht_f32[1:].astype(jnp.bfloat16)            # (nb-1, H, H)
        bh_rest = bht_f32[1:]                                 # (nb-1, H, 1)
    else:  # keep non-zero leading dim for BlockSpec; kernel loop is empty
        wh_rest = jnp.zeros((1, H, H), jnp.bfloat16)
        bh_rest = jnp.zeros((1, H, 1), jnp.float32)
    nr_dim = max(n_rest, 1)

    wlt = jnp.transpose(wl).astype(jnp.bfloat16)              # (out_dim, H)
    blt = jnp.transpose(bl)                                   # (out_dim, 1)

    # ---- row tile: multiple of 128 lanes, clamped for small N; pad remainder --
    tm = max(128, (min(tm, pl.cdiv(N, 128) * 128) // 128) * 128)
    n_pad = pl.cdiv(N, tm) * tm

    # TODO(synk): if the producer/consumer can work in (dim, N)/(out_dim, N)
    # layout directly, these wrapper transposes (extra HBM passes) go away.
    xt = jnp.transpose(x.reshape(N, dim))                     # (dim, N)
    if n_pad != N:
        xt = jnp.pad(xt, ((0, 0), (0, n_pad - N)))            # zero-filled pad columns

    kernel = make_siren_kernel(n_rest, dim)

    out_t = pl.pallas_call(
        kernel,
        out_shape=jax.ShapeDtypeStruct((out_dim, n_pad), x.dtype),
        grid_spec=pltpu.PrefetchScalarGridSpec(
            num_scalar_prefetch=0,
            grid=(n_pad // tm,),
            in_specs=[
                pl.BlockSpec((dim, tm), lambda i: (0, i)),         # x columns (lane-dense)
                pl.BlockSpec((H, dim), lambda i: (0, 0)),          # folded W0'
                pl.BlockSpec((H, 1), lambda i: (0, 0)),            # folded b0'
                pl.BlockSpec((nr_dim, H, H), lambda i: (0, 0, 0)), # remaining hidden W (bf16)
                pl.BlockSpec((nr_dim, H, 1), lambda i: (0, 0, 0)), # remaining hidden b (f32)
                pl.BlockSpec((out_dim, H), lambda i: (0, 0)),      # last W (bf16)
                pl.BlockSpec((out_dim, 1), lambda i: (0, 0)),      # last b
            ],
            out_specs=pl.BlockSpec((out_dim, tm), lambda i: (0, i)),
        ),
        compiler_params=pltpu.CompilerParams(
            # Row blocks are independent -> shards across v7x's 2 TensorCores.
            dimension_semantics=("parallel",),
        ),
    )(xt, w0p, b0p, wh_rest, bh_rest, wlt, blt)

    out2d = jnp.transpose(out_t[:, :N])                       # (N, out_dim)
    return out2d.reshape(bs, npts, out_dim)


# ----------------------------- params ---------------------------------------
def init_params(key, cfg):
    """Deterministic init mirroring the module's sine_init / default bias init.

    sine_init: weight ~ U(-sqrt(6/fan_in)/30, sqrt(6/fan_in)/30)
    bias (PyTorch Linear default): U(-1/sqrt(fan_in), 1/sqrt(fan_in))
    Weights stored as (in_features, out_features).
    """
    dim, H, out_dim, nb = cfg.dim, cfg.hidden_size, cfg.out_dim, cfg.n_blocks
    keys = jax.random.split(key, 2 * (nb + 2))
    ki = iter(range(len(keys)))

    def w_init(k, fan_in, fan_out):
        bound = math.sqrt(6.0 / fan_in) / 30.0
        return jax.random.uniform(k, (fan_in, fan_out), jnp.float32, -bound, bound)

    def b_init(k, fan_in, fan_out):
        bound = 1.0 / math.sqrt(fan_in)
        return jax.random.uniform(k, (1, fan_out), jnp.float32, -bound, bound)

    w0 = w_init(keys[next(ki)], dim, H)
    b0 = b_init(keys[next(ki)], dim, H)

    wh_list, bh_list = [], []
    for _ in range(nb):
        wh_list.append(w_init(keys[next(ki)], H, H))
        bh_list.append(b_init(keys[next(ki)], H, H))
    wh = jnp.stack(wh_list, axis=0)                 # (nb, H, H)
    bh = jnp.stack(bh_list, axis=0)                 # (nb, 1, H)

    wl = w_init(keys[next(ki)], H, out_dim)
    bl = b_init(keys[next(ki)], H, out_dim)

    return w0, b0, wh, bh, wl, bl


def siren_reference(x, params, cfg):
    """Pure-JAX f32 reference (full-accuracy jnp.sin) for correctness checking."""
    w0, b0, wh, bh, wl, bl = params
    nb = cfg.n_blocks
    if cfg.use_hierarchial_consts:
        consts = [cfg.const * (i + 1) for i in range(nb + 1)]
    else:
        consts = [cfg.const] * nb
    net = x @ w0 + b0
    for i in range(nb):
        net = jnp.sin(consts[i] * (net @ wh[i] + bh[i]))
    return net @ wl + bl


# ----------------------------- main ------------------------------------------
if __name__ == "__main__":
    cfg = Cfg()
    key = jax.random.PRNGKey(0)
    kx, kp = jax.random.split(key)

    bs, npoints = 2, 64
    x = jax.random.uniform(kx, (bs, npoints, cfg.dim), jnp.float32, -1.0, 1.0)

    params = init_params(kp, cfg)

    out = siren_forward(x, params, cfg)
    out = jax.block_until_ready(out)

    ref = siren_reference(x, params, cfg)
    assert out.shape == (bs, npoints, cfg.out_dim)
    # Hidden/last matmuls use bf16 MXU operands and a reduced-accuracy sine
    # (~1e-4); compare against the pure-f32 reference with a matching tolerance.
    assert jnp.allclose(out, ref, atol=2e-2, rtol=2e-2), "mismatch vs reference"

    print("KERNEL_OK")
</pallas_src>

<mosaic_0001>
module attributes {stable_mosaic.version = 11 : i64} {
  func.func @kernel(%arg0: i32, %arg1: memref<3x128xf32, #tpu.memory_space<vmem>>, %arg2: memref<32x3xf32, #tpu.memory_space<vmem>>, %arg3: memref<32x1xf32, #tpu.memory_space<vmem>>, %arg4: memref<2x32x32xbf16, #tpu.memory_space<vmem>>, %arg5: memref<2x32x1xf32, #tpu.memory_space<vmem>>, %arg6: memref<3x32xbf16, #tpu.memory_space<vmem>>, %arg7: memref<3x1xf32, #tpu.memory_space<vmem>>, %arg8: memref<3x128xf32, #tpu.memory_space<vmem>>) attributes {dimension_semantics = [#tpu.dimension_semantics<parallel>], iteration_bounds = array<i64: 1>, scalar_prefetch = 0 : i64, scratch_operands = 0 : i64, tpu.core_type = #tpu.core_type<tc>, window_params = [{transform_indices = @transform_0, window_bounds = array<i64: 3, 128>}, {pipeline_mode = #tpu.pipeline_mode<synchronous>, transform_indices = @transform_1, window_bounds = array<i64: 32, 3>}, {pipeline_mode = #tpu.pipeline_mode<synchronous>, transform_indices = @transform_2, window_bounds = array<i64: 32, 1>}, {pipeline_mode = #tpu.pipeline_mode<synchronous>, transform_indices = @transform_3, window_bounds = array<i64: 2, 32, 32>}, {pipeline_mode = #tpu.pipeline_mode<synchronous>, transform_indices = @transform_4, window_bounds = array<i64: 2, 32, 1>}, {pipeline_mode = #tpu.pipeline_mode<synchronous>, transform_indices = @transform_5, window_bounds = array<i64: 3, 32>}, {pipeline_mode = #tpu.pipeline_mode<synchronous>, transform_indices = @transform_6, window_bounds = array<i64: 3, 1>}, {transform_indices = @transform_7, window_bounds = array<i64: 3, 128>}]} {
    %c0 = arith.constant 0 : index
    %c0_0 = arith.constant 0 : index
    %0 = vector.load %arg1[%c0, %c0_0] : memref<3x128xf32, #tpu.memory_space<vmem>>, vector<3x128xf32>
    %c0_1 = arith.constant 0 : index
    %c0_2 = arith.constant 0 : index
    %1 = vector.load %arg2[%c0_1, %c0_2] : memref<32x3xf32, #tpu.memory_space<vmem>>, vector<32x3xf32>
    %2 = vector.extract_strided_slice %1 {offsets = [0, 0], sizes = [32, 1], strides = [1, 1]} : vector<32x3xf32> to vector<32x1xf32>
    %3 = vector.extract_strided_slice %0 {offsets = [0, 0], sizes = [1, 128], strides = [1, 1]} : vector<3x128xf32> to vector<1x128xf32>
    %4 = vector.broadcast %2 : vector<32x1xf32> to vector<32x128xf32>
    %5 = vector.broadcast %3 : vector<1x128xf32> to vector<32x128xf32>
    %6 = arith.mulf %4, %5 : vector<32x128xf32>
    %7 = vector.extract_strided_slice %1 {offsets = [0, 1], sizes = [32, 1], strides = [1, 1]} : vector<32x3xf32> to vector<32x1xf32>
    %8 = vector.extract_strided_slice %0 {offsets = [1, 0], sizes = [1, 128], strides = [1, 1]} : vector<3x128xf32> to vector<1x128xf32>
    %9 = vector.broadcast %7 : vector<32x1xf32> to vector<32x128xf32>
    %10 = vector.broadcast %8 : vector<1x128xf32> to vector<32x128xf32>
    %11 = arith.mulf %9, %10 : vector<32x128xf32>
    %12 = arith.addf %6, %11 : vector<32x128xf32>
    %13 = vector.extract_strided_slice %1 {offsets = [0, 2], sizes = [32, 1], strides = [1, 1]} : vector<32x3xf32> to vector<32x1xf32>
    %14 = vector.extract_strided_slice %0 {offsets = [2, 0], sizes = [1, 128], strides = [1, 1]} : vector<3x128xf32> to vector<1x128xf32>
    %15 = vector.broadcast %13 : vector<32x1xf32> to vector<32x128xf32>
    %16 = vector.broadcast %14 : vector<1x128xf32> to vector<32x128xf32>
    %17 = arith.mulf %15, %16 : vector<32x128xf32>
    %18 = arith.addf %12, %17 : vector<32x128xf32>
    %c0_3 = arith.constant 0 : index
    %c0_4 = arith.constant 0 : index
    %19 = vector.load %arg3[%c0_3, %c0_4] : memref<32x1xf32, #tpu.memory_space<vmem>>, vector<32x1xf32>
    %20 = vector.broadcast %19 : vector<32x1xf32> to vector<32x128xf32>
    %21 = arith.addf %18, %20 : vector<32x128xf32>
    %cst = arith.constant 0.318309873 : f32
    %22 = vector.broadcast %cst : f32 to vector<32x128xf32>
    %23 = arith.mulf %21, %22 : vector<32x128xf32>
    %cst_5 = arith.constant 5.000000e-01 : f32
    %24 = vector.broadcast %cst_5 : f32 to vector<32x128xf32>
    %25 = arith.addf %23, %24 : vector<32x128xf32>
    %26 = math.floor %25 : vector<32x128xf32>
    %cst_6 = arith.constant 3.14159274 : f32
    %27 = vector.broadcast %cst_6 : f32 to vector<32x128xf32>
    %28 = arith.mulf %26, %27 : vector<32x128xf32>
    %29 = arith.subf %21, %28 : vector<32x128xf32>
    %cst_7 = arith.constant -8.74227765E-8 : f32
    %30 = vector.broadcast %cst_7 : f32 to vector<32x128xf32>
    %31 = arith.mulf %26, %30 : vector<32x128xf32>
    %32 = arith.subf %29, %31 : vector<32x128xf32>
    %33 = arith.mulf %32, %32 : vector<32x128xf32>
    %34 = arith.mulf %32, %33 : vector<32x128xf32>
    %cst_8 = arith.constant -1.98408743E-4 : f32
    %35 = vector.broadcast %cst_8 : f32 to vector<32x128xf32>
    %36 = arith.mulf %33, %35 : vector<32x128xf32>
    %cst_9 = arith.constant 0.00833333097 : f32
    %37 = vector.broadcast %cst_9 : f32 to vector<32x128xf32>
    %38 = arith.addf %37, %36 : vector<32x128xf32>
    %39 = arith.mulf %33, %38 : vector<32x128xf32>
    %cst_10 = arith.constant -0.166666672 : f32
    %40 = vector.broadcast %cst_10 : f32 to vector<32x128xf32>
    %41 = arith.addf %40, %39 : vector<32x128xf32>
    %42 = arith.mulf %34, %41 : vector<32x128xf32>
    %43 = arith.addf %32, %42 : vector<32x128xf32>
    %44 = arith.fptosi %26 : vector<32x128xf32> to vector<32x128xi32>
    %c1_i32 = arith.constant 1 : i32
    %45 = vector.broadcast %c1_i32 : i32 to vector<32x128xi32>
    %46 = arith.andi %44, %45 : vector<32x128xi32>
    %c0_i32 = arith.constant 0 : i32
    %47 = vector.broadcast %c0_i32 : i32 to vector<32x128xi32>
    %48 = arith.cmpi eq, %46, %47 : vector<32x128xi32>
    %cst_11 = arith.constant 0.000000e+00 : f32
    %49 = vector.broadcast %cst_11 : f32 to vector<32x128xf32>
    %50 = arith.subf %49, %43 : vector<32x128xf32>
    %51 = arith.select %48, %43, %50 : vector<32x128xi1>, vector<32x128xf32>
    %c0_12 = arith.constant 0 : index
    %c0_13 = arith.constant 0 : index
    %c0_14 = arith.constant 0 : index
    %52 = vector.load %arg4[%c0_12, %c0_13, %c0_14] : memref<2x32x32xbf16, #tpu.memory_space<vmem>>, vector<1x32x32xbf16>
    %53 = vector.shape_cast %52 : vector<1x32x32xbf16> to vector<32x32xbf16>
    %54 = arith.truncf %51 : vector<32x128xf32> to vector<32x128xbf16>
    %cst_15 = arith.constant dense<0.000000e+00> : vector<32x128xf32>
    %55 = tpu.matmul %53, %54, %cst_15 {dimension_numbers = #tpu.dot_dimension_numbers<[1], [0], [0], [1], [0, 0, 1, 1], [], []>} : vector<32x32xbf16>, vector<32x128xbf16>, vector<32x128xf32> -> vector<32x128xf32>
    %c0_16 = arith.constant 0 : index
    %c0_17 = arith.constant 0 : index
    %c0_18 = arith.constant 0 : index
    %56 = vector.load %arg5[%c0_16, %c0_17, %c0_18] : memref<2x32x1xf32, #tpu.memory_space<vmem>>, vector<1x32x1xf32>
    %57 = vector.shape_cast %56 : vector<1x32x1xf32> to vector<32x1xf32>
    %58 = vector.broadcast %57 : vector<32x1xf32> to vector<32x128xf32>
    %59 = arith.addf %55, %58 : vector<32x128xf32>
    %cst_19 = arith.constant 0.318309873 : f32
    %60 = vector.broadcast %cst_19 : f32 to vector<32x128xf32>
    %61 = arith.mulf %59, %60 : vector<32x128xf32>
    %cst_20 = arith.constant 5.000000e-01 : f32
    %62 = vector.broadcast %cst_20 : f32 to vector<32x128xf32>
    %63 = arith.addf %61, %62 : vector<32x128xf32>
    %64 = math.floor %63 : vector<32x128xf32>
    %cst_21 = arith.constant 3.14159274 : f32
    %65 = vector.broadcast %cst_21 : f32 to vector<32x128xf32>
    %66 = arith.mulf %64, %65 : vector<32x128xf32>
    %67 = arith.subf %59, %66 : vector<32x128xf32>
    %cst_22 = arith.constant -8.74227765E-8 : f32
    %68 = vector.broadcast %cst_22 : f32 to vector<32x128xf32>
    %69 = arith.mulf %64, %68 : vector<32x128xf32>
    %70 = arith.subf %67, %69 : vector<32x128xf32>
    %71 = arith.mulf %70, %70 : vector<32x128xf32>
    %72 = arith.mulf %70, %71 : vector<32x128xf32>
    %cst_23 = arith.constant -1.98408743E-4 : f32
    %73 = vector.broadcast %cst_23 : f32 to vector<32x128xf32>
    %74 = arith.mulf %71, %73 : vector<32x128xf32>
    %cst_24 = arith.constant 0.00833333097 : f32
    %75 = vector.broadcast %cst_24 : f32 to vector<32x128xf32>
    %76 = arith.addf %75, %74 : vector<32x128xf32>
    %77 = arith.mulf %71, %76 : vector<32x128xf32>
    %cst_25 = arith.constant -0.166666672 : f32
    %78 = vector.broadcast %cst_25 : f32 to vector<32x128xf32>
    %79 = arith.addf %78, %77 : vector<32x128xf32>
    %80 = arith.mulf %72, %79 : vector<32x128xf32>
    %81 = arith.addf %70, %80 : vector<32x128xf32>
    %82 = arith.fptosi %64 : vector<32x128xf32> to vector<32x128xi32>
    %c1_i32_26 = arith.constant 1 : i32
    %83 = vector.broadcast %c1_i32_26 : i32 to vector<32x128xi32>
    %84 = arith.andi %82, %83 : vector<32x128xi32>
    %c0_i32_27 = arith.constant 0 : i32
    %85 = vector.broadcast %c0_i32_27 : i32 to vector<32x128xi32>
    %86 = arith.cmpi eq, %84, %85 : vector<32x128xi32>
    %cst_28 = arith.constant 0.000000e+00 : f32
    %87 = vector.broadcast %cst_28 : f32 to vector<32x128xf32>
    %88 = arith.subf %87, %81 : vector<32x128xf32>
    %89 = arith.select %86, %81, %88 : vector<32x128xi1>, vector<32x128xf32>
    %c1 = arith.constant 1 : index
    %c0_29 = arith.constant 0 : index
    %c0_30 = arith.constant 0 : index
    %90 = vector.load %arg4[%c1, %c0_29, %c0_30] : memref<2x32x32xbf16, #tpu.memory_space<vmem>>, vector<1x32x32xbf16>
    %91 = vector.shape_cast %90 : vector<1x32x32xbf16> to vector<32x32xbf16>
    %92 = arith.truncf %89 : vector<32x128xf32> to vector<32x128xbf16>
    %cst_31 = arith.constant dense<0.000000e+00> : vector<32x128xf32>
    %93 = tpu.matmul %91, %92, %cst_31 {dimension_numbers = #tpu.dot_dimension_numbers<[1], [0], [0], [1], [0, 0, 1, 1], [], []>} : vector<32x32xbf16>, vector<32x128xbf16>, vector<32x128xf32> -> vector<32x128xf32>
    %c1_32 = arith.constant 1 : index
    %c0_33 = arith.constant 0 : index
    %c0_34 = arith.constant 0 : index
    %94 = vector.load %arg5[%c1_32, %c0_33, %c0_34] : memref<2x32x1xf32, #tpu.memory_space<vmem>>, vector<1x32x1xf32>
    %95 = vector.shape_cast %94 : vector<1x32x1xf32> to vector<32x1xf32>
    %96 = vector.broadcast %95 : vector<32x1xf32> to vector<32x128xf32>
    %97 = arith.addf %93, %96 : vector<32x128xf32>
    %cst_35 = arith.constant 0.318309873 : f32
    %98 = vector.broadcast %cst_35 : f32 to vector<32x128xf32>
    %99 = arith.mulf %97, %98 : vector<32x128xf32>
    %cst_36 = arith.constant 5.000000e-01 : f32
    %100 = vector.broadcast %cst_36 : f32 to vector<32x128xf32>
    %101 = arith.addf %99, %100 : vector<32x128xf32>
    %102 = math.floor %101 : vector<32x128xf32>
    %cst_37 = arith.constant 3.14159274 : f32
    %103 = vector.broadcast %cst_37 : f32 to vector<32x128xf32>
    %104 = arith.mulf %102, %103 : vector<32x128xf32>
    %105 = arith.subf %97, %104 : vector<32x128xf32>
    %cst_38 = arith.constant -8.74227765E-8 : f32
    %106 = vector.broadcast %cst_38 : f32 to vector<32x128xf32>
    %107 = arith.mulf %102, %106 : vector<32x128xf32>
    %108 = arith.subf %105, %107 : vector<32x128xf32>
    %109 = arith.mulf %108, %108 : vector<32x128xf32>
    %110 = arith.mulf %108, %109 : vector<32x128xf32>
    %cst_39 = arith.constant -1.98408743E-4 : f32
    %111 = vector.broadcast %cst_39 : f32 to vector<32x128xf32>
    %112 = arith.mulf %109, %111 : vector<32x128xf32>
    %cst_40 = arith.constant 0.00833333097 : f32
    %113 = vector.broadcast %cst_40 : f32 to vector<32x128xf32>
    %114 = arith.addf %113, %112 : vector<32x128xf32>
    %115 = arith.mulf %109, %114 : vector<32x128xf32>
    %cst_41 = arith.constant -0.166666672 : f32
    %116 = vector.broadcast %cst_41 : f32 to vector<32x128xf32>
    %117 = arith.addf %116, %115 : vector<32x128xf32>
    %118 = arith.mulf %110, %117 : vector<32x128xf32>
    %119 = arith.addf %108, %118 : vector<32x128xf32>
    %120 = arith.fptosi %102 : vector<32x128xf32> to vector<32x128xi32>
    %c1_i32_42 = arith.constant 1 : i32
    %121 = vector.broadcast %c1_i32_42 : i32 to vector<32x128xi32>
    %122 = arith.andi %120, %121 : vector<32x128xi32>
    %c0_i32_43 = arith.constant 0 : i32
    %123 = vector.broadcast %c0_i32_43 : i32 to vector<32x128xi32>
    %124 = arith.cmpi eq, %122, %123 : vector<32x128xi32>
    %cst_44 = arith.constant 0.000000e+00 : f32
    %125 = vector.broadcast %cst_44 : f32 to vector<32x128xf32>
    %126 = arith.subf %125, %119 : vector<32x128xf32>
    %127 = arith.select %124, %119, %126 : vector<32x128xi1>, vector<32x128xf32>
    %c0_45 = arith.constant 0 : index
    %c0_46 = arith.constant 0 : index
    %128 = vector.load %arg6[%c0_45, %c0_46] : memref<3x32xbf16, #tpu.memory_space<vmem>>, vector<3x32xbf16>
    %129 = arith.truncf %127 : vector<32x128xf32> to vector<32x128xbf16>
    %cst_47 = arith.constant dense<0.000000e+00> : vector<3x128xf32>
    %130 = tpu.matmul %128, %129, %cst_47 {dimension_numbers = #tpu.dot_dimension_numbers<[1], [0], [0], [1], [0, 0, 1, 1], [], []>} : vector<3x32xbf16>, vector<32x128xbf16>, vector<3x128xf32> -> vector<3x128xf32>
    %c0_48 = arith.constant 0 : index
    %c0_49 = arith.constant 0 : index
    %131 = vector.load %arg7[%c0_48, %c0_49] : memref<3x1xf32, #tpu.memory_space<vmem>>, vector<3x1xf32>
    %132 = vector.broadcast %131 : vector<3x1xf32> to vector<3x128xf32>
    %133 = arith.addf %130, %132 : vector<3x128xf32>
    %c0_50 = arith.constant 0 : index
    %c0_51 = arith.constant 0 : index
    %134 = vector.load %arg8[%c0_50, %c0_51] : memref<3x128xf32, #tpu.memory_space<vmem>>, vector<3x128xf32>
    tpu.vector_store %arg8[%c0_50, %c0_51], %133 {strides = array<i32>} : memref<3x128xf32, #tpu.memory_space<vmem>>, vector<3x128xf32>,
    return
  }
  func.func @transform_0(%arg0: i32) -> (i32, i32) {
    %c0_i32 = arith.constant 0 : i32
    %c0_i32_0 = arith.constant 0 : i32
    return %c0_i32, %arg0 : i32, i32
  }
  func.func @transform_1(%arg0: i32) -> (i32, i32) {
    %c0_i32 = arith.constant 0 : i32
    %c0_i32_0 = arith.constant 0 : i32
    %c0_i32_1 = arith.constant 0 : i32
    return %c0_i32, %c0_i32_0 : i32, i32
  }
  func.func @transform_2(%arg0: i32) -> (i32, i32) {
    %c0_i32 = arith.constant 0 : i32
    %c0_i32_0 = arith.constant 0 : i32
    %c0_i32_1 = arith.constant 0 : i32
    return %c0_i32, %c0_i32_0 : i32, i32
  }
  func.func @transform_3(%arg0: i32) -> (i32, i32, i32) {
    %c0_i32 = arith.constant 0 : i32
    %c0_i32_0 = arith.constant 0 : i32
    %c0_i32_1 = arith.constant 0 : i32
    %c0_i32_2 = arith.constant 0 : i32
    return %c0_i32, %c0_i32_0, %c0_i32_1 : i32, i32, i32
  }
  func.func @transform_4(%arg0: i32) -> (i32, i32, i32) {
    %c0_i32 = arith.constant 0 : i32
    %c0_i32_0 = arith.constant 0 : i32
    %c0_i32_1 = arith.constant 0 : i32
    %c0_i32_2 = arith.constant 0 : i32
    return %c0_i32, %c0_i32_0, %c0_i32_1 : i32, i32, i32
  }
  func.func @transform_5(%arg0: i32) -> (i32, i32) {
    %c0_i32 = arith.constant 0 : i32
    %c0_i32_0 = arith.constant 0 : i32
    %c0_i32_1 = arith.constant 0 : i32
    return %c0_i32, %c0_i32_0 : i32, i32
  }
  func.func @transform_6(%arg0: i32) -> (i32, i32) {
    %c0_i32 = arith.constant 0 : i32
    %c0_i32_0 = arith.constant 0 : i32
    %c0_i32_1 = arith.constant 0 : i32
    return %c0_i32, %c0_i32_0 : i32, i32
  }
  func.func @transform_7(%arg0: i32) -> (i32, i32) {
    %c0_i32 = arith.constant 0 : i32
    %c0_i32_0 = arith.constant 0 : i32
    return %c0_i32, %arg0 : i32, i32
  }
}

</mosaic_0001>

<bundles_post_ra>
// kernel: tpu_custom_call.1
= control target key start
LH: loop header
LB: loop body
LE: loop exit
PB: predicated region body
PF: predicated region fallthrough
CT: control target
= control target key end

     0   :  { %v763_v1 = vmov 2   ;;  %v764_v2 = vmov 1   ;;  %s898_s0 = inlined_call_operand.vmem [shape: f32[3,128], index: 0, kind: input, shape index: {}]   ;;  %s899_s1 = inlined_call_operand.vmem [shape: f32[32,3], index: 1, kind: input, shape index: {}]   ;;  %s900_s2 = inlined_call_operand.vmem [shape: f32[32,1], index: 2, kind: input, shape index: {}]   ;;  %s901_s3 = inlined_call_operand.vmem [shape: bf16[2,32,32], index: 3, kind: input, shape index: {}]   ;;  %s902_s4 = inlined_call_operand.vmem [shape: f32[2,32,1], index: 4, kind: input, shape index: {}]   ;;  %s903_s5 = inlined_call_operand.vmem [shape: bf16[3,32], index: 5, kind: input, shape index: {}]   ;;  %s904_s6 = inlined_call_operand.vmem [shape: f32[3,1], index: 6, kind: input, shape index: {}]   ;;  %s905_s7 = inlined_call_operand.hbm [shape: f32[3,128], index: 7, kind: output, shape index: {}]  }
   0x1   :  { %v29_v0 = vld [vmem:[%s899_s1] sm:$0xff]  ;;  %728 = vset.pattern.permute.xlu0 %v763_v1  ;;  %727 = vset.pattern.permute.xlu1 %v764_v2  ;;  %v31_v3 = vld [vmem:[%s899_s1 + $0x10] sm:$0xff]  ;;  %v30_v4 = vld [vmem:[%s899_s1 + $0x8] sm:$0xff] }
   0x2   :  { %90 = vperm.xlu0 %728, %v29_v0   ;;  %62 = vperm.xlu1 %727, %v29_v0  }
   0x6   :  { %98 = vperm.xlu0 %728, %v31_v3   ;;  %66 = vperm.xlu1 %727, %v30_v4  }
   0x7   :  { %12 = vsyncpa [#allocation3], 0  ;;  %v765_v5 = vmov 0   ;;  %v32_v6 = vld [vmem:[%s899_s1 + $0x18] sm:$0xff]  ;;  %v118_v7 = vld [vmem:[%s900_s2 + $0x8] sm:$0xff]  ;;  %vm265_vm0 = vcmask 261120   ;;  %v53_v21 = vlaneseq }
   0x8   :  { %v231_v8 = vld [vmem:[%s902_s4] sm:$0xff]  ;;  %v233_v9 = vld [vmem:[%s902_s4 + $0x10] sm:$0xff]  ;;  %v120_v15 = vld [vmem:[%s900_s2 + $0x18] sm:$0xff]  ;;  %vm767_vm9 = vmmov 0   ;;  %s768_s17 = smov [#allocation2]  }
   0x9   :  { %v653_v10 = vld [vmem:[%s902_s4 + $0x20] sm:$0xff]  ;;  %v655_v12 = vld [vmem:[%s902_s4 + $0x30] sm:$0xff]  ;;  %v232_v16 = vld [vmem:[%s902_s4 + $0x8] sm:$0xff]  ;;  %v54_v24 = vshrl.u32 %v53_v21, 7  ;;  %s637_s18 = sshll.u32 %s768_s17, 4  ;;  %s638_s18 = int_to_ptr.vmem [resolvable:$true] %s637_s18 }
   0xa   :  { %732 = vset.pattern.permute.xlu0 %v765_v5  ;;  %729 = vset.pattern.permute.xlu1 %v763_v1  ;;  %v117_v11 = vld [vmem:[%s900_s2] sm:$0xff]  ;;  %v119_v13 = vld [vmem:[%s900_s2 + $0x10] sm:$0xff]  ;;  %v234_v17 = vld [vmem:[%s902_s4 + $0x18] sm:$0xff]  ;;  %s739_s19 = scalar_lea.vmem %s638_s18, 64  ;;  %p744_p1 = scmp.lt.s32.totalorder %s638_s18, %s638_s18 }
   0xb   :  { %35 = vperm.xlu0 %732, %v29_v0   ;;  %94 = vperm.xlu1 %729, %v30_v4   ;;  %v581_v14 = vld [vmem:[%s904_s6] sm:$0x7]  ;;  %v654_v18 = vld [vmem:[%s902_s4 + $0x28] sm:$0xff]  ;;  %v656_v19 = vld [vmem:[%s902_s4 + $0x38] sm:$0xff]  ;;  %v79_v27 = vsub.s32 1, %v54_v24  ;;  %v55_v28 = vsub.s32 0, %v54_v24  ;;  %p740_p0 = scmp.ne.s32.totalorder %s638_s18, %s739_s19  ;;  %p745_p2 = scmp.lt.s32.totalorder %s739_s19, %s739_s19 }
   0xc   :  { %v735_v20 = vld [vmem:[%s901_s3] sm:$0xff]   ;;  %v107_v32 = vsub.s32 2, %v54_v24 }
   0xd   :  { %677 = vmatprep.mubr.msk.bf16.mxu0 %vm265_vm0, %v735_v20  ;;  %v28_v29 = vld [vmem:[%s898_s0] sm:$0x7]  ;;  %p746_p3 = por %p745_p2, %p744_p1 }
   0xe   :  { %v80_v33 = vrot.slane %v28_v29, %v79_v27  ;;  %v56_v34 = vrot.slane %v28_v29, %v55_v28  ;;  %v108_v36 = vrot.slane %v28_v29, %v107_v32 }
   0xf   :  { %40 = vperm.xlu0 %732, %v30_v4   ;;  %730 = vset.pattern.permute.xlu1 %v765_v5  ;;  %p747_p4 = pnand %p746_p3, %p740_p0 }
  0x10   :  { %45 = vperm.xlu1 %730, %v31_v3  }
  0x13   :  { %50 = vperm.xlu0 %732, %v32_v6  }
  0x14   :  { %731 = vset.pattern.permute.xlu1 %v764_v2 }
  0x15   :  { %70 = vperm.xlu1 %731, %v31_v3  }
  0x17   :  { %128 = vperm.xlu0 %732, %v118_v7  }
  0x19   :  { %74 = vperm.xlu1 %731, %v32_v6  }
  0x1b   :  { %237 = vperm.xlu0 %732, %v231_v8  }
  0x1d   :  { %733 = vset.pattern.permute.xlu1 %v763_v1 }
  0x1e   :  { %102 = vperm.xlu1 %733, %v32_v6  }
  0x1f   :  { %247 = vperm.xlu0 %732, %v233_v9  }
  0x22   :  { %734 = vset.pattern.permute.xlu1 %v765_v5 }
  0x23   :  { %415 = vperm.xlu0 %732, %v653_v10   ;;  %123 = vperm.xlu1 %734, %v117_v11  }
  0x27   :  { %425 = vperm.xlu0 %732, %v655_v12   ;;  %133 = vperm.xlu1 %734, %v119_v13  }
  0x2b   :  { %584 = vperm.xlu0 %732, %v581_v14   ;;  %138 = vperm.xlu1 %734, %v120_v15  }
  0x2f   :  { %242 = vperm.xlu1 %734, %v232_v16  }
  0x33   :  { %252 = vperm.xlu1 %734, %v234_v17  }
  0x37   :  { %420 = vperm.xlu1 %734, %v654_v18  }
  0x3b   :  { %430 = vperm.xlu1 %734, %v656_v19  }
  0x81   :  { %v63_v22 = vpop.permute.xlu1 %62  ;;  %v91_v23 = vpop.permute.xlu0 %90 }
  0x82   :  { %v81_v50 = vmul.f32 %v80_v33, %v63_v22  ;;  %v109_v52 = vmul.f32 %v108_v36, %v91_v23 }
  0x85   :  { %v67_v25 = vpop.permute.xlu1 %66  ;;  %v99_v26 = vpop.permute.xlu0 %98 }
  0x86   :  { %v82_v37 = vmul.f32 %v80_v33, %v67_v25  ;;  %v111_v63 = vmul.f32 %v108_v36, %v99_v26 }
  0x8a   :  { %v36_v30 = vpop.permute.xlu0 %35  ;;  %v95_v31 = vpop.permute.xlu1 %94 }
  0x8b   :  { %v110_v42 = vmul.f32 %v108_v36, %v95_v31  ;;  %v57_v48 = vmul.f32 %v56_v34, %v36_v30 }
  0x8d   :  { %v85_v53 = vadd.f32 %v81_v50, %v57_v48 }
  0x8e   :  { %v41_v35 = vpop.permute.xlu0 %40 }
  0x8f   :  { %v58_v38 = vmul.f32 %v56_v34, %v41_v35  ;;  %v46_v39 = vpop.permute.xlu1 %45  ;;  %v113_v62 = vadd.f32 %v109_v52, %v85_v53 }
  0x90   :  { %v59_v57 = vmul.f32 %v56_v34, %v46_v39 }
  0x91   :  { %v86_v40 = vadd.f32 %v82_v37, %v58_v38 }
  0x92   :  { %v51_v41 = vpop.permute.xlu0 %50 }
  0x93   :  { %v114_v44 = vadd.f32 %v110_v42, %v86_v40  ;;  %v60_v1 = vmul.f32 %v56_v34, %v51_v41 }
  0x94   :  { %v71_v43 = vpop.permute.xlu1 %70 }
  0x95   :  { %v83_v54 = vmul.f32 %v80_v33, %v71_v43 }
  0x96   :  { %v129_v45 = vpop.permute.xlu0 %128 }
  0x97   :  { %v142_v46 = vadd.f32 %v129_v45, %v114_v44  ;;  %v87_v59 = vadd.f32 %v83_v54, %v59_v57 }
  0x98   :  { %v75_v47 = vpop.permute.xlu1 %74 }
  0x99   :  { %v146_v49 = vmul.f32 0.31830987, %v142_v46  ;;  %v84_v3 = vmul.f32 %v80_v33, %v75_v47  ;;  %v115_v8 = vadd.f32 %v111_v63, %v87_v59 }
  0x9b   :  { %v150_v51 = vadd.f32 0.5, %v146_v49  ;;  %v88_v11 = vadd.f32 %v84_v3, %v60_v1 }
  0x9d   :  { %v154_v55 = vfloor.f32 %v150_v51  ;;  %v103_v56 = vpop.permute.xlu1 %102 }
  0x9e   :  { %v112_v6 = vmul.f32 %v108_v36, %v103_v56 }
  0x9f   :  { %v158_v58 = vmul.f32 3.1415927, %v154_v55  ;;  %v166_v61 = vmul.f32 -8.742278e-08, %v154_v55  ;;  %v699_v38 = vtrunc.f32 %v154_v55 }
  0xa0   :  { %v116_v16 = vadd.f32 %v112_v6, %v88_v11 }
  0xa1   :  { %v162_v60 = vsub.f32 %v142_v46, %v158_v58  ;;  %v700_v48 = vcvt.f32.s32 %v699_v38 }
  0xa2   :  { %v124_v0 = vpop.permute.xlu1 %123 }
  0xa3   :  { %v170_v2 = vsub.f32 %v162_v60, %v166_v61  ;;  %v141_v4 = vadd.f32 %v124_v0, %v113_v62  ;;  %v210_v55 = vand.u32 1, %v700_v48 }
  0xa5   :  { %v174_v5 = vmul.f32 %v170_v2, %v170_v2  ;;  %v145_v7 = vmul.f32 0.31830987, %v141_v4  ;;  %vm214_vm2 = vcmp.eq.s32.totalorder %v210_v55, 0 }
  0xa6   :  { %v134_v9 = vpop.permute.xlu1 %133 }
  0xa7   :  { %v182_v10 = vmul.f32 -0.00019840874, %v174_v5  ;;  %v149_v12 = vadd.f32 0.5, %v145_v7  ;;  %v143_v13 = vadd.f32 %v134_v9, %v115_v8  ;;  %v178_v35 = vmul.f32 %v174_v5, %v170_v2 }
  0xa9   :  { %v153_v14 = vfloor.f32 %v149_v12  ;;  %v147_v15 = vmul.f32 0.31830987, %v143_v13  ;;  %v186_v17 = vadd.f32 0.008333331, %v182_v10 }
  0xaa   :  { %v139_v18 = vpop.permute.xlu1 %138 }
  0xab   :  { %v157_v19 = vmul.f32 3.1415927, %v153_v14  ;;  %v151_v20 = vadd.f32 0.5, %v147_v15  ;;  %v144_v21 = vadd.f32 %v139_v18, %v116_v16  ;;  %v165_v22 = vmul.f32 -8.742278e-08, %v153_v14 }
  0xac   :  { %v190_v26 = vmul.f32 %v186_v17, %v174_v5  ;;  %v697_v40 = vtrunc.f32 %v153_v14 }
  0xad   :  { %v161_v23 = vsub.f32 %v141_v4, %v157_v19  ;;  %v155_v24 = vfloor.f32 %v151_v20  ;;  %v148_v25 = vmul.f32 0.31830987, %v144_v21 }
  0xae   :  { %v194_v33 = vadd.f32 -0.16666667, %v190_v26  ;;  %v698_v50 = vcvt.f32.s32 %v697_v40  ;;  %v238_v26 = vpop.permute.xlu0 %237 }
  0xaf   :  { %v169_v27 = vsub.f32 %v161_v23, %v165_v22  ;;  %v159_v28 = vmul.f32 3.1415927, %v155_v24  ;;  %v152_v29 = vadd.f32 0.5, %v148_v25  ;;  %v167_v32 = vmul.f32 -8.742278e-08, %v155_v24  ;;  %v737_v25 = vld [vmem:[%s901_s3 + $0x10] sm:$0xff]  }
  0xb0   :  { %v198_v43 = vmul.f32 %v194_v33, %v178_v35  ;;  %v701_v59 = vtrunc.f32 %v155_v24  ;;  %v209_v62 = vand.u32 1, %v698_v50  ;;  %v736_v24 = vld [vmem:[%s901_s3 + $0x8] sm:$0xff]   ;;  %685 = vmatprep.mubr.msk.bf16.mxu1 %vm265_vm0, %v737_v25 }
  0xb1   :  { %v173_v30 = vmul.f32 %v169_v27, %v169_v27  ;;  %v163_v31 = vsub.f32 %v143_v13, %v159_v28  ;;  %v156_v34 = vfloor.f32 %v152_v29 }
  0xb2   :  { %v202_v54 = vadd.f32 %v198_v43, %v170_v2  ;;  %vm213_vm1 = vcmp.eq.s32.totalorder %v209_v62, 0  ;;  %v702_v9 = vcvt.f32.s32 %v701_v59  ;;  %v248_v28 = vpop.permute.xlu0 %247 }
  0xb3   :  { %v181_v36 = vmul.f32 -0.00019840874, %v173_v30  ;;  %v171_v37 = vsub.f32 %v163_v31, %v167_v32  ;;  %v160_v39 = vmul.f32 3.1415927, %v156_v34  ;;  %v168_v45 = vmul.f32 -8.742278e-08, %v156_v34 }
  0xb4   :  { %v177_v51 = vmul.f32 %v173_v30, %v169_v27  ;;  %v703_v61 = vtrunc.f32 %v156_v34  ;;  %v218_v3 = vsub.f32 0.0, %v202_v54  ;;  %v211_v16 = vand.u32 1, %v702_v9 }
  0xb5   :  { %v175_v41 = vmul.f32 %v171_v37, %v171_v37  ;;  %v185_v42 = vadd.f32 0.008333331, %v181_v36  ;;  %v164_v44 = vsub.f32 %v144_v21, %v160_v39 }
  0xb6   :  { %v222_v2 = vsel %vm214_vm2, %v202_v54, %v218_v3  ;;  %v704_v10 = vcvt.f32.s32 %v703_v61  ;;  %vm215_vm3 = vcmp.eq.s32.totalorder %v211_v16, 0 }
  0xb7   :  { %v183_v46 = vmul.f32 -0.00019840874, %v175_v41  ;;  %v189_v47 = vmul.f32 %v185_v42, %v173_v30  ;;  %v172_v49 = vsub.f32 %v164_v44, %v168_v45  ;;  %v179_v63 = vmul.f32 %v175_v41, %v171_v37 }
  0xb8   :  { %v212_v17 = vand.u32 1, %v704_v10 }
  0xb9   :  { %v187_v52 = vadd.f32 0.008333331, %v183_v46  ;;  %v193_v53 = vadd.f32 -0.16666667, %v189_v47  ;;  %v176_v56 = vmul.f32 %v172_v49, %v172_v49 }
  0xba   :  { %vm216_vm4 = vcmp.eq.s32.totalorder %v212_v17, 0 }
  0xbb   :  { %v191_v57 = vmul.f32 %v187_v52, %v175_v41  ;;  %v197_v58 = vmul.f32 %v193_v53, %v177_v51  ;;  %v184_v60 = vmul.f32 -0.00019840874, %v176_v56  ;;  %v180_v12 = vmul.f32 %v176_v56, %v172_v49 }
  0xbd   :  { %v195_v0 = vadd.f32 -0.16666667, %v191_v57  ;;  %v201_v1 = vadd.f32 %v197_v58, %v169_v27  ;;  %v188_v4 = vadd.f32 0.008333331, %v184_v60  ;;  %v243_v27 = vpop.permute.xlu1 %242 }
  0xbf   :  { %v199_v5 = vmul.f32 %v195_v0, %v179_v63  ;;  %v217_v6 = vsub.f32 0.0, %v201_v1  ;;  %v192_v7 = vmul.f32 %v188_v4, %v176_v56 }
  0xc1   :  { %v221_v8 = vsel %vm213_vm1, %v201_v1, %v217_v6  ;;  %v203_v11 = vadd.f32 %v199_v5, %v171_v37  ;;  %v196_v13 = vadd.f32 -0.16666667, %v192_v7  ;;  %v253_v32 = vpop.permute.xlu1 %252 }
  0xc2   :  { %v229_v14 = vpack.c.bf16 %v222_v2, %v221_v8 }
  0xc3   :  { %v200_v15 = vmul.f32 %v196_v13, %v180_v12  ;;  %v219_v19 = vsub.f32 0.0, %v203_v11 }
  0xc4   :  { %673 = vmatprep.subr.bf16.mxu0 %v229_v14 }
  0xc5   :  { %674 = vmatpush3.bf16.msra.mxu0 %v229_v14  ;;  %v204_v18 = vadd.f32 %v200_v15, %v172_v49  ;;  %v223_v21 = vsel %vm215_vm3, %v203_v11, %v219_v19 }
  0xc7   :  { %v220_v20 = vsub.f32 0.0, %v204_v18 }
  0xc9   :  { %v224_v22 = vsel %vm216_vm4, %v204_v18, %v220_v20 }
  0xca   :  { %v230_v23 = vpack.c.bf16 %v224_v22, %v223_v21 }
  0xcc   :  { %675 = vmatprep.subr.bf16.mxu0 %v230_v23 }
  0xcd   :  { %676 = vmatpush3.bf16.msra.mxu0 %v230_v23 }
  0xd0   :  { %678 = vmatmul.mubr.msk.bf16.vlgmr.msra.gmra.mrb[0].mxu0 %vm265_vm0, %v736_v24 }
 0x1a3   :  { %v679_v29 = vpop.f32.mrb[0].mxu0 }
 0x1a4   :  { %v315_v30 = vadd.f32 %v679_v29, %v248_v28  ;;  %v306_v31 = vpop.f32.mrb[1].mxu0 }
 0x1a5   :  { %v307_v33 = vadd.f32 %v306_v31, %v238_v26  ;;  %v680_v34 = vpop.f32.mrb[2].mxu0 }
 0x1a6   :  { %v323_v35 = vmul.f32 0.31830987, %v315_v30  ;;  %v318_v36 = vadd.f32 %v680_v34, %v253_v32  ;;  %v309_v37 = vpop.f32.mrb[3].mxu0 }
 0x1a7   :  { %v321_v38 = vmul.f32 0.31830987, %v307_v33  ;;  %v310_v39 = vadd.f32 %v309_v37, %v243_v27 }
 0x1a8   :  { %v327_v40 = vadd.f32 0.5, %v323_v35  ;;  %v324_v41 = vmul.f32 0.31830987, %v318_v36 }
 0x1a9   :  { %v325_v42 = vadd.f32 0.5, %v321_v38  ;;  %v322_v43 = vmul.f32 0.31830987, %v310_v39 }
 0x1aa   :  { %v331_v44 = vfloor.f32 %v327_v40  ;;  %v328_v45 = vadd.f32 0.5, %v324_v41 }
 0x1ab   :  { %v329_v46 = vfloor.f32 %v325_v42  ;;  %v326_v47 = vadd.f32 0.5, %v322_v43 }
 0x1ac   :  { %v335_v48 = vmul.f32 3.1415927, %v331_v44  ;;  %v332_v49 = vfloor.f32 %v328_v45  ;;  %v343_v53 = vmul.f32 -8.742278e-08, %v331_v44  ;;  %v709_v10 = vtrunc.f32 %v331_v44 }
 0x1ad   :  { %v333_v50 = vmul.f32 3.1415927, %v329_v46  ;;  %v330_v51 = vfloor.f32 %v326_v47  ;;  %v341_v57 = vmul.f32 -8.742278e-08, %v329_v46  ;;  %v705_v2 = vtrunc.f32 %v329_v46 }
 0x1ae   :  { %v339_v52 = vsub.f32 %v315_v30, %v335_v48  ;;  %v336_v54 = vmul.f32 3.1415927, %v332_v49  ;;  %v344_v60 = vmul.f32 -8.742278e-08, %v332_v49  ;;  %v711_v12 = vtrunc.f32 %v332_v49 }
 0x1af   :  { %v337_v56 = vsub.f32 %v307_v33, %v333_v50  ;;  %v334_v58 = vmul.f32 3.1415927, %v330_v51  ;;  %v342_v63 = vmul.f32 -8.742278e-08, %v330_v51  ;;  %v707_v17 = vtrunc.f32 %v330_v51 }
 0x1b0   :  { %v347_v55 = vsub.f32 %v339_v52, %v343_v53  ;;  %v340_v59 = vsub.f32 %v318_v36, %v336_v54  ;;  %v706_v20 = vcvt.f32.s32 %v705_v2  ;;  %v710_v24 = vcvt.f32.s32 %v709_v10 }
 0x1b1   :  { %v345_v61 = vsub.f32 %v337_v56, %v341_v57  ;;  %v338_v62 = vsub.f32 %v310_v39, %v334_v58  ;;  %v712_v28 = vcvt.f32.s32 %v711_v12  ;;  %v708_v32 = vcvt.f32.s32 %v707_v17  ;;  %v738_v57 = vld [vmem:[%s901_s3 + $0x18] sm:$0xff]  }
 0x1b2   :  { %v351_v0 = vmul.f32 %v347_v55, %v347_v55  ;;  %v348_v1 = vsub.f32 %v340_v59, %v344_v60  ;;  %v387_v40 = vand.u32 1, %v710_v24  ;;  %v385_v43 = vand.u32 1, %v706_v20  ;;  %v421_v59 = vpop.permute.xlu1 %420 }
 0x1b3   :  { %v349_v3 = vmul.f32 %v345_v61, %v345_v61  ;;  %v346_v4 = vsub.f32 %v338_v62, %v342_v63  ;;  %v388_v41 = vand.u32 1, %v712_v28  ;;  %v386_v44 = vand.u32 1, %v708_v32 }
 0x1b4   :  { %v359_v5 = vmul.f32 -0.00019840874, %v351_v0  ;;  %v352_v6 = vmul.f32 %v348_v1, %v348_v1  ;;  %v355_v21 = vmul.f32 %v351_v0, %v347_v55  ;;  %vm391_vm5 = vcmp.eq.s32.totalorder %v387_v40, 0 }
 0x1b5   :  { %v357_v7 = vmul.f32 -0.00019840874, %v349_v3  ;;  %v350_v8 = vmul.f32 %v346_v4, %v346_v4  ;;  %v353_v25 = vmul.f32 %v349_v3, %v345_v61  ;;  %vm392_vm6 = vcmp.eq.s32.totalorder %v388_v41, 0 }
 0x1b6   :  { %v363_v9 = vadd.f32 0.008333331, %v359_v5  ;;  %v360_v11 = vmul.f32 -0.00019840874, %v352_v6  ;;  %v356_v30 = vmul.f32 %v352_v6, %v348_v1  ;;  %vm389_vm7 = vcmp.eq.s32.totalorder %v385_v43, 0 }
 0x1b7   :  { %v358_v13 = vmul.f32 -0.00019840874, %v350_v8  ;;  %v361_v14 = vadd.f32 0.008333331, %v357_v7  ;;  %v354_v33 = vmul.f32 %v350_v8, %v346_v4  ;;  %vm390_vm8 = vcmp.eq.s32.totalorder %v386_v44, 0 }
 0x1b8   :  { %v367_v15 = vmul.f32 %v363_v9, %v351_v0  ;;  %v364_v16 = vadd.f32 0.008333331, %v360_v11  ;;  %v766_v58 = vmov 0.0   ;;  %v431_v0 = vpop.permute.xlu1 %430 }
 0x1b9   :  { %v362_v18 = vadd.f32 0.008333331, %v358_v13  ;;  %v365_v19 = vmul.f32 %v361_v14, %v349_v3  ;;  %689 = vmatprep.subr.bf16.mxu0 %v766_v58  ;;  %693 = vmatprep.mubr.msk.bf16.mxu0 %vm767_vm9, %v766_v58 }
 0x1ba   :  { %v371_v22 = vadd.f32 -0.16666667, %v367_v15  ;;  %v368_v23 = vmul.f32 %v364_v16, %v352_v6 }
 0x1bb   :  { %v366_v26 = vmul.f32 %v362_v18, %v350_v8  ;;  %v369_v27 = vadd.f32 -0.16666667, %v365_v19 }
 0x1bc   :  { %v375_v29 = vmul.f32 %v371_v22, %v355_v21  ;;  %v372_v31 = vadd.f32 -0.16666667, %v368_v23 }
 0x1bd   :  { %v370_v34 = vadd.f32 -0.16666667, %v366_v26  ;;  %v373_v35 = vmul.f32 %v369_v27, %v353_v25 }
 0x1be   :  { %v379_v36 = vadd.f32 %v375_v29, %v347_v55  ;;  %v376_v37 = vmul.f32 %v372_v31, %v356_v30  ;;  %v416_v55 = vpop.permute.xlu0 %415 }
 0x1bf   :  { %v374_v38 = vmul.f32 %v370_v34, %v354_v33  ;;  %v377_v39 = vadd.f32 %v373_v35, %v345_v61 }
 0x1c0   :  { %v380_v42 = vadd.f32 %v376_v37, %v348_v1  ;;  %v395_v45 = vsub.f32 0.0, %v379_v36 }
 0x1c1   :  { %v378_v46 = vadd.f32 %v374_v38, %v346_v4  ;;  %v393_v47 = vsub.f32 0.0, %v377_v39 }
 0x1c2   :  { %v396_v48 = vsub.f32 0.0, %v380_v42  ;;  %v399_v50 = vsel %vm391_vm5, %v379_v36, %v395_v45  ;;  %v426_v60 = vpop.permute.xlu0 %425 }
 0x1c3   :  { %v394_v49 = vsub.f32 0.0, %v378_v46  ;;  %v397_v52 = vsel %vm389_vm7, %v377_v39, %v393_v47 }
 0x1c4   :  { %v400_v51 = vsel %vm392_vm6, %v380_v42, %v396_v48 }
 0x1c5   :  { %v398_v53 = vsel %vm390_vm8, %v378_v46, %v394_v49  ;;  %v407_v54 = vpack.c.bf16 %v400_v51, %v399_v50 }
 0x1c6   :  { %v406_v56 = vpack.c.bf16 %v398_v53, %v397_v52 }
 0x1c8   :  { %681 = vmatprep.subr.bf16.mxu1 %v406_v56 }
 0x1c9   :  { %682 = vmatpush3.bf16.msra.mxu1 %v406_v56 }
 0x1ca   :  { %683 = vmatprep.subr.bf16.mxu1 %v407_v54 }
 0x1cd   :  { %684 = vmatpush3.bf16.msra.mxu1 %v407_v54 }
 0x1d0   :  { %686 = vmatmul.mubr.msk.bf16.vlgmr.msra.gmra.mrb[0].mxu1 %vm265_vm0, %v738_v57 }
 0x2a3   :  { %v687_v61 = vpop.f32.mrb[0].mxu1 }
 0x2a4   :  { %v492_v62 = vadd.f32 %v687_v61, %v426_v60  ;;  %v483_v63 = vpop.f32.mrb[1].mxu1 }
 0x2a5   :  { %v484_v1 = vadd.f32 %v483_v63, %v416_v55  ;;  %v688_v3 = vpop.f32.mrb[2].mxu1 }
 0x2a6   :  { %v500_v4 = vmul.f32 0.31830987, %v492_v62  ;;  %v495_v5 = vadd.f32 %v688_v3, %v431_v0  ;;  %v486_v6 = vpop.f32.mrb[3].mxu1 }
 0x2a7   :  { %v498_v7 = vmul.f32 0.31830987, %v484_v1  ;;  %v487_v8 = vadd.f32 %v486_v6, %v421_v59 }
 0x2a8   :  { %v504_v2 = vadd.f32 0.5, %v500_v4  ;;  %v501_v9 = vmul.f32 0.31830987, %v495_v5 }
 0x2a9   :  { %v502_v10 = vadd.f32 0.5, %v498_v7  ;;  %v499_v11 = vmul.f32 0.31830987, %v487_v8 }
 0x2aa   :  { %v508_v12 = vfloor.f32 %v504_v2  ;;  %v505_v13 = vadd.f32 0.5, %v501_v9 }
 0x2ab   :  { %v506_v14 = vfloor.f32 %v502_v10  ;;  %v503_v15 = vadd.f32 0.5, %v499_v11 }
 0x2ac   :  { %v512_v16 = vmul.f32 3.1415927, %v508_v12  ;;  %v509_v17 = vfloor.f32 %v505_v13  ;;  %v520_v21 = vmul.f32 -8.742278e-08, %v508_v12  ;;  %v717_v38 = vtrunc.f32 %v508_v12 }
 0x2ad   :  { %v510_v18 = vmul.f32 3.1415927, %v506_v14  ;;  %v507_v19 = vfloor.f32 %v503_v15  ;;  %v518_v24 = vmul.f32 -8.742278e-08, %v506_v14  ;;  %v713_v42 = vtrunc.f32 %v506_v14 }
 0x2ae   :  { %v516_v20 = vsub.f32 %v492_v62, %v512_v16  ;;  %v513_v22 = vmul.f32 3.1415927, %v509_v17  ;;  %v521_v28 = vmul.f32 -8.742278e-08, %v509_v17  ;;  %v719_v45 = vtrunc.f32 %v509_v17 }
 0x2af   :  { %v514_v23 = vsub.f32 %v484_v1, %v510_v18  ;;  %v511_v25 = vmul.f32 3.1415927, %v507_v19  ;;  %v519_v31 = vmul.f32 -8.742278e-08, %v507_v19  ;;  %v715_v49 = vtrunc.f32 %v507_v19 }
 0x2b0   :  { %v524_v26 = vsub.f32 %v516_v20, %v520_v21  ;;  %v517_v27 = vsub.f32 %v495_v5, %v513_v22  ;;  %v718_v50 = vcvt.f32.s32 %v717_v38  ;;  %v714_v56 = vcvt.f32.s32 %v713_v42 }
 0x2b1   :  { %v522_v29 = vsub.f32 %v514_v23, %v518_v24  ;;  %v515_v30 = vsub.f32 %v487_v8, %v511_v25  ;;  %v720_v60 = vcvt.f32.s32 %v719_v45  ;;  %v716_v1 = vcvt.f32.s32 %v715_v49  ;;  %v578_v25 = vld [vmem:[%s903_s5] sm:$0x3] }
 0x2b2   :  { %v528_v32 = vmul.f32 %v524_v26, %v524_v26  ;;  %v525_v33 = vsub.f32 %v517_v27, %v521_v28  ;;  %v564_v8 = vand.u32 1, %v718_v50  ;;  %v562_v12 = vand.u32 1, %v714_v56 }
 0x2b3   :  { %v526_v34 = vmul.f32 %v522_v29, %v522_v29  ;;  %v523_v35 = vsub.f32 %v515_v30, %v519_v31  ;;  %v565_v9 = vand.u32 1, %v720_v60  ;;  %v563_v14 = vand.u32 1, %v716_v1 }
 0x2b4   :  { %v536_v36 = vmul.f32 -0.00019840874, %v528_v32  ;;  %v529_v37 = vmul.f32 %v525_v33, %v525_v33  ;;  %v532_v53 = vmul.f32 %v528_v32, %v524_v26  ;;  %vm568_vm10 = vcmp.eq.s32.totalorder %v564_v8, 0 }
 0x2b5   :  { %v534_v39 = vmul.f32 -0.00019840874, %v526_v34  ;;  %v527_v40 = vmul.f32 %v523_v35, %v523_v35  ;;  %v530_v55 = vmul.f32 %v526_v34, %v522_v29  ;;  %vm569_vm11 = vcmp.eq.s32.totalorder %v565_v9, 0 }
 0x2b6   :  { %v540_v41 = vadd.f32 0.008333331, %v536_v36  ;;  %v537_v43 = vmul.f32 -0.00019840874, %v529_v37  ;;  %v533_v63 = vmul.f32 %v529_v37, %v525_v33  ;;  %vm566_vm12 = vcmp.eq.s32.totalorder %v562_v12, 0 }
 0x2b7   :  { %v538_v44 = vadd.f32 0.008333331, %v534_v39  ;;  %v535_v46 = vmul.f32 -0.00019840874, %v527_v40  ;;  %v531_v4 = vmul.f32 %v527_v40, %v523_v35  ;;  %vm567_vm13 = vcmp.eq.s32.totalorder %v563_v14, 0 }
 0x2b8   :  { %v544_v47 = vmul.f32 %v540_v41, %v528_v32  ;;  %v541_v48 = vadd.f32 0.008333331, %v537_v43 }
 0x2b9   :  { %v542_v51 = vmul.f32 %v538_v44, %v526_v34  ;;  %v539_v52 = vadd.f32 0.008333331, %v535_v46 }
 0x2ba   :  { %v548_v54 = vadd.f32 -0.16666667, %v544_v47  ;;  %v545_v57 = vmul.f32 %v541_v48, %v529_v37 }
 0x2bb   :  { %v546_v59 = vadd.f32 -0.16666667, %v542_v51  ;;  %v543_v61 = vmul.f32 %v539_v52, %v527_v40 }
 0x2bc   :  { %v552_v62 = vmul.f32 %v548_v54, %v532_v53  ;;  %v549_v0 = vadd.f32 -0.16666667, %v545_v57 }
 0x2bd   :  { %v550_v3 = vmul.f32 %v546_v59, %v530_v55  ;;  %v547_v5 = vadd.f32 -0.16666667, %v543_v61 }
 0x2be   :  { %v556_v6 = vadd.f32 %v552_v62, %v524_v26  ;;  %v553_v7 = vmul.f32 %v549_v0, %v533_v63  ;;  %v585_v26 = vpop.permute.xlu0 %584 }
 0x2bf   :  { %v554_v2 = vadd.f32 %v550_v3, %v522_v29  ;;  %v551_v10 = vmul.f32 %v547_v5, %v531_v4 }
 0x2c0   :  { %v572_v11 = vsub.f32 0.0, %v556_v6  ;;  %v557_v13 = vadd.f32 %v553_v7, %v525_v33 }
 0x2c1   :  { %v570_v15 = vsub.f32 0.0, %v554_v2  ;;  %v555_v16 = vadd.f32 %v551_v10, %v523_v35 }
 0x2c2   :  { %v573_v17 = vsub.f32 0.0, %v557_v13  ;;  %v576_v19 = vsel %vm568_vm10, %v556_v6, %v572_v11 }
 0x2c3   :  { %v571_v18 = vsub.f32 0.0, %v555_v16  ;;  %v574_v21 = vsel %vm566_vm12, %v554_v2, %v570_v15 }
 0x2c4   :  { %v577_v20 = vsel %vm569_vm11, %v557_v13, %v573_v17 }
 0x2c5   :  { %v575_v22 = vsel %vm567_vm13, %v555_v16, %v571_v18  ;;  %v580_v23 = vpack.c.bf16 %v577_v20, %v576_v19 }
 0x2c6   :  { %v579_v24 = vpack.c.bf16 %v575_v22, %v574_v21 }
 0x2c8   :  { %690 = vmatpush3.bf16.msra.mxu0 %v579_v24 }
 0x2c9   :  { %691 = vmatprep.subr.bf16.mxu0 %v766_v58 }
 0x2cc   :  { %692 = vmatpush3.bf16.msra.mxu0 %v580_v23 }
 0x2cf   :  { %694 = vmatmul.mubr.msk.bf16.vlgmr.msra.gmra.mrb[4].mxu0 %vm265_vm0, %v578_v25 }
 0x3a2   :  { %v624_v27 = vpop.f32.mrb[4].mxu0 }
 0x3a3   :  { %v625_v28 = vadd.f32 %v624_v27, %v585_v26  ;;  %v695_v29 = vpop.f32.mrb[5].mxu0 }
 0x3a4   :  { %v627_v30 = vpop.f32.mrb[6].mxu0 }
 0x3a5   :  { %630 = vst [vmem:[#allocation2] sm:$0x7] %v625_v28  ;;  %v696_v31 = vpop.f32.mrb[7].mxu0 }
 0x3a6   :  { %750 = shalt.err (!%p747_p4)
}
 0x3a7   :  { %s751_s21 = scalar_lea.hbm %s905_s7, 64 }
 0x3a8   :  { %p752_p5 = scmp.ne.s32.totalorder %s905_s7, %s751_s21  ;;  %p755_p6 = scmp.lt.u32.totalorder %s751_s21, %s905_s7 }
 0x3aa   :  { %p757_p7 = pnand %p755_p6, %p752_p5 }
 0x3ac   :  { %760 = shalt.err (!%p757_p7)
}
 0x3ad   :  { %640 = dma.vmem_to_hbm [thread:$0]  %s638_s18, 64, %s905_s7, [#allocation3]  }
 0x3ae   :  { %761 = dma.done.wait [#allocation3], 64  }
 0x3af   :  { %762 = vsyncadd [#allocation3], 4294967232 }
 0x3b0   :  { %644 = vsyncpa [#allocation3], 1 }

</bundles_post_ra>
